<compile_context>
chip_gen: v7x
topology: tpu7x:2x2x1
jax: 0.10.0
libtpu: 0.0.40
codegen_flags: <defaults>
</compile_context>

<pallas_src>
import jax
import jax.numpy as jnp
from jax.experimental import pallas as pl
from jax.experimental.pallas import tpu as pltpu

LANES = 128
MAX_TILE_M = 4096   # 4096x128 f32 = 2 MiB per input per block


def _dice_partial_kernel(x_ref, y_ref, o_ref, acc_i_ref, acc_u_ref):
    i = pl.program_id(0)

    # Initialize per-lane accumulators on the first grid step.
    @pl.when(i == 0)
    def _():
        acc_i_ref[...] = jnp.zeros_like(acc_i_ref)
        acc_u_ref[...] = jnp.zeros_like(acc_u_ref)

    # Threshold in native dtype, cast, reduce along sublanes to per-lane partials.
    xb = (x_ref[...] > 0.5).astype(jnp.float32)
    yb = (y_ref[...] > 0.5).astype(jnp.float32)
    acc_i_ref[...] += jnp.sum(xb * yb, axis=0, keepdims=True)   # intersection / lane
    acc_u_ref[...] += jnp.sum(xb + yb, axis=0, keepdims=True)   # sum(x)+sum(y) / lane

    # One cross-lane reduce + scalar store, only on the last grid step.
    @pl.when(i == pl.num_programs(0) - 1)
    def _():
        o_ref[0] = jnp.sum(acc_i_ref[...])
        o_ref[1] = jnp.sum(acc_u_ref[...])


def _threshold_partials(x, y):
    xb = (x > 0.5).astype(jnp.float32)
    yb = (y > 0.5).astype(jnp.float32)
    return jnp.sum(xb * yb), jnp.sum(xb) + jnp.sum(yb)


def dice_loss(input_arr, target_arr, smooth=1e-5):
    """Pallas TPU Dice loss. Matches PyTorch DiceLoss.forward semantics."""
    x = jnp.asarray(input_arr).reshape(-1)   # keep native dtype
    y = jnp.asarray(target_arr).reshape(-1)
    assert x.shape == y.shape

    n = x.shape[0]
    rows_total = n // LANES

    if rows_total == 0:
        # Smaller than one lane row; pure JAX.
        inter, union = _threshold_partials(x, y)
    else:
        tile_m = min(MAX_TILE_M, rows_total)       # full-slab block for small inputs
        num_blocks = rows_total // tile_m
        rows_main = num_blocks * tile_m
        n_main = rows_main * LANES

        if n_main == n:
            x2 = x.reshape(rows_main, LANES)       # bitcast reshape, no copy
            y2 = y.reshape(rows_main, LANES)
        else:
            x2 = x[:n_main].reshape(rows_main, LANES)
            y2 = y[:n_main].reshape(rows_main, LANES)

        partials = pl.pallas_call(
            _dice_partial_kernel,
            out_shape=jax.ShapeDtypeStruct((2,), jnp.float32),
            grid_spec=pltpu.PrefetchScalarGridSpec(
                num_scalar_prefetch=0,
                grid=(num_blocks,),
                in_specs=[
                    pl.BlockSpec((tile_m, LANES), lambda i: (i, 0)),
                    pl.BlockSpec((tile_m, LANES), lambda i: (i, 0)),
                ],
                out_specs=pl.BlockSpec(memory_space=pltpu.SMEM),
                scratch_shapes=[
                    pltpu.VMEM((1, LANES), jnp.float32),   # intersection per lane
                    pltpu.VMEM((1, LANES), jnp.float32),   # union per lane
                ],
            ),
            compiler_params=pltpu.CompilerParams(
                dimension_semantics=("arbitrary",),
            ),
        )(x2, y2)

        inter = partials[0]
        union = partials[1]

        if n_main != n:
            # Sub-block tail: reduce with plain jnp and fold into the partials.
            t_inter, t_union = _threshold_partials(x[n_main:], y[n_main:])
            inter = inter + t_inter
            union = union + t_union

    dice_score = (2.0 * inter + smooth) / (union + smooth)
    return 1.0 - dice_score


def _dice_loss_ref(input_arr, target_arr, smooth=1e-5):
    x = (jnp.asarray(input_arr, jnp.float32) > 0.5).astype(jnp.float32)
    y = (jnp.asarray(target_arr, jnp.float32) > 0.5).astype(jnp.float32)
    inter = jnp.sum(x * y)
    union = jnp.sum(x) + jnp.sum(y)
    return 1.0 - (2.0 * inter + smooth) / (union + smooth)


if __name__ == "__main__":
    key = jax.random.PRNGKey(0)
    k1, k2 = jax.random.split(key)
    # NCHW-style prediction / mask pair.
    shape = (2, 4, 16, 16)
    x = jax.random.uniform(k1, shape, dtype=jnp.float32)
    t = jax.random.uniform(k2, shape, dtype=jnp.float32)

    loss = dice_loss(x, t)
    jax.block_until_ready(loss)

    ref = _dice_loss_ref(x, t)
    assert jnp.allclose(loss, ref, atol=1e-6, rtol=1e-6), (loss, ref)
    print("KERNEL_OK")
</pallas_src>

<mosaic_0001>
module attributes {stable_mosaic.version = 11 : i64} {
  func.func @_dice_partial_kernel(%arg0: i32, %arg1: memref<16x128xf32, #tpu.memory_space<vmem>>, %arg2: memref<16x128xf32, #tpu.memory_space<vmem>>, %arg3: memref<2xf32, #tpu.memory_space<smem>>, %arg4: memref<1x128xf32, #tpu.memory_space<vmem>>, %arg5: memref<1x128xf32, #tpu.memory_space<vmem>>) attributes {dimension_semantics = [#tpu.dimension_semantics<arbitrary>], iteration_bounds = array<i64: 1>, scalar_prefetch = 0 : i64, scratch_operands = 2 : i64, tpu.core_type = #tpu.core_type<tc>, window_params = [{transform_indices = @transform_0, window_bounds = array<i64: 16, 128>}, {transform_indices = @transform_1, window_bounds = array<i64: 16, 128>}, {transform_indices = @transform_2, window_bounds = array<i64: 2>}]} {
    %c0_i32 = arith.constant 0 : i32
    %0 = arith.cmpi eq, %arg0, %c0_i32 : i32
    %1 = arith.extui %0 : i1 to i32
    %c0_i32_0 = arith.constant 0 : i32
    %2 = arith.cmpi ne, %1, %c0_i32_0 : i32
    scf.if %2 {
      %cst_17 = arith.constant 0.000000e+00 : f32
      %28 = vector.broadcast %cst_17 : f32 to vector<1x128xf32>
      %c0_18 = arith.constant 0 : index
      %c0_19 = arith.constant 0 : index
      %29 = vector.load %arg4[%c0_18, %c0_19] : memref<1x128xf32, #tpu.memory_space<vmem>>, vector<1x128xf32>
      tpu.vector_store %arg4[%c0_18, %c0_19], %28 {strides = array<i32>} : memref<1x128xf32, #tpu.memory_space<vmem>>, vector<1x128xf32>,
      %cst_20 = arith.constant 0.000000e+00 : f32
      %30 = vector.broadcast %cst_20 : f32 to vector<1x128xf32>
      %c0_21 = arith.constant 0 : index
      %c0_22 = arith.constant 0 : index
      %31 = vector.load %arg5[%c0_21, %c0_22] : memref<1x128xf32, #tpu.memory_space<vmem>>, vector<1x128xf32>
      tpu.vector_store %arg5[%c0_21, %c0_22], %30 {strides = array<i32>} : memref<1x128xf32, #tpu.memory_space<vmem>>, vector<1x128xf32>,
    } else {
    }
    %c0 = arith.constant 0 : index
    %c0_1 = arith.constant 0 : index
    %3 = vector.load %arg1[%c0, %c0_1] : memref<16x128xf32, #tpu.memory_space<vmem>>, vector<16x128xf32>
    %cst = arith.constant 5.000000e-01 : f32
    %4 = vector.broadcast %cst : f32 to vector<16x128xf32>
    %5 = arith.cmpf ogt, %3, %4 : vector<16x128xf32>
    %6 = arith.extui %5 : vector<16x128xi1> to vector<16x128xi32>
    %7 = arith.sitofp %6 : vector<16x128xi32> to vector<16x128xf32>
    %c0_2 = arith.constant 0 : index
    %c0_3 = arith.constant 0 : index
    %8 = vector.load %arg2[%c0_2, %c0_3] : memref<16x128xf32, #tpu.memory_space<vmem>>, vector<16x128xf32>
    %cst_4 = arith.constant 5.000000e-01 : f32
    %9 = vector.broadcast %cst_4 : f32 to vector<16x128xf32>
    %10 = arith.cmpf ogt, %8, %9 : vector<16x128xf32>
    %11 = arith.extui %10 : vector<16x128xi1> to vector<16x128xi32>
    %12 = arith.sitofp %11 : vector<16x128xi32> to vector<16x128xf32>
    %c0_5 = arith.constant 0 : index
    %c0_6 = arith.constant 0 : index
    %13 = vector.load %arg4[%c0_5, %c0_6] : memref<1x128xf32, #tpu.memory_space<vmem>>, vector<1x128xf32>
    %14 = arith.mulf %7, %12 : vector<16x128xf32>
    %cst_7 = arith.constant dense<0.000000e+00> : vector<128xf32>
    %15 = vector.multi_reduction <add>, %14, %cst_7 [0] : vector<16x128xf32> to vector<128xf32>
    %16 = vector.shape_cast %15 : vector<128xf32> to vector<1x128xf32>
    %17 = arith.addf %13, %16 : vector<1x128xf32>
    %c0_8 = arith.constant 0 : index
    %c0_9 = arith.constant 0 : index
    %18 = vector.load %arg4[%c0_8, %c0_9] : memref<1x128xf32, #tpu.memory_space<vmem>>, vector<1x128xf32>
    tpu.vector_store %arg4[%c0_8, %c0_9], %17 {strides = array<i32>} : memref<1x128xf32, #tpu.memory_space<vmem>>, vector<1x128xf32>,
    %c0_10 = arith.constant 0 : index
    %c0_11 = arith.constant 0 : index
    %19 = vector.load %arg5[%c0_10, %c0_11] : memref<1x128xf32, #tpu.memory_space<vmem>>, vector<1x128xf32>
    %20 = arith.addf %7, %12 : vector<16x128xf32>
    %cst_12 = arith.constant dense<0.000000e+00> : vector<128xf32>
    %21 = vector.multi_reduction <add>, %20, %cst_12 [0] : vector<16x128xf32> to vector<128xf32>
    %22 = vector.shape_cast %21 : vector<128xf32> to vector<1x128xf32>
    %23 = arith.addf %19, %22 : vector<1x128xf32>
    %c0_13 = arith.constant 0 : index
    %c0_14 = arith.constant 0 : index
    %24 = vector.load %arg5[%c0_13, %c0_14] : memref<1x128xf32, #tpu.memory_space<vmem>>, vector<1x128xf32>
    tpu.vector_store %arg5[%c0_13, %c0_14], %23 {strides = array<i32>} : memref<1x128xf32, #tpu.memory_space<vmem>>, vector<1x128xf32>,
    %c0_i32_15 = arith.constant 0 : i32
    %25 = arith.cmpi eq, %arg0, %c0_i32_15 : i32
    %26 = arith.extui %25 : i1 to i32
    %c0_i32_16 = arith.constant 0 : i32
    %27 = arith.cmpi ne, %26, %c0_i32_16 : i32
    scf.if %27 {
      %c0_17 = arith.constant 0 : index
      %c0_18 = arith.constant 0 : index
      %28 = vector.load %arg4[%c0_17, %c0_18] : memref<1x128xf32, #tpu.memory_space<vmem>>, vector<1x128xf32>
      %29 = vector.shape_cast %28 : vector<1x128xf32> to vector<1x1x128xf32>
      %cst_19 = arith.constant dense<0.000000e+00> : vector<1xf32>
      %30 = vector.multi_reduction <add>, %29, %cst_19 [1, 2] : vector<1x1x128xf32> to vector<1xf32>
      %31 = vector.shape_cast %30 : vector<1xf32> to vector<1x1x1xf32>
      %32 = vector.extract %31[0, 0, 0] : f32 from vector<1x1x1xf32>
      %c0_20 = arith.constant 0 : index
      %33 = memref.load %arg3[%c0_20] : memref<2xf32, #tpu.memory_space<smem>>
      memref.store %32, %arg3[%c0_20] : memref<2xf32, #tpu.memory_space<smem>>
      %c0_21 = arith.constant 0 : index
      %c0_22 = arith.constant 0 : index
      %34 = vector.load %arg5[%c0_21, %c0_22] : memref<1x128xf32, #tpu.memory_space<vmem>>, vector<1x128xf32>
      %35 = vector.shape_cast %34 : vector<1x128xf32> to vector<1x1x128xf32>
      %cst_23 = arith.constant dense<0.000000e+00> : vector<1xf32>
      %36 = vector.multi_reduction <add>, %35, %cst_23 [1, 2] : vector<1x1x128xf32> to vector<1xf32>
      %37 = vector.shape_cast %36 : vector<1xf32> to vector<1x1x1xf32>
      %38 = vector.extract %37[0, 0, 0] : f32 from vector<1x1x1xf32>
      %c1 = arith.constant 1 : index
      %39 = memref.load %arg3[%c1] : memref<2xf32, #tpu.memory_space<smem>>
      memref.store %38, %arg3[%c1] : memref<2xf32, #tpu.memory_space<smem>>
    } else {
    }
    return
  }
  func.func @transform_0(%arg0: i32) -> (i32, i32) {
    %c0_i32 = arith.constant 0 : i32
    %c0_i32_0 = arith.constant 0 : i32
    return %arg0, %c0_i32 : i32, i32
  }
  func.func @transform_1(%arg0: i32) -> (i32, i32) {
    %c0_i32 = arith.constant 0 : i32
    %c0_i32_0 = arith.constant 0 : i32
    return %arg0, %c0_i32 : i32, i32
  }
  func.func @transform_2(%arg0: i32) -> i32 {
    %c0_i32 = arith.constant 0 : i32
    %c0_i32_0 = arith.constant 0 : i32
    return %c0_i32 : i32
  }
}

</mosaic_0001>

<bundles_post_ra>
// kernel: tpu_custom_call.1
= control target key start
LH: loop header
LB: loop body
LE: loop exit
PB: predicated region body
PF: predicated region fallthrough
CT: control target
= control target key end

     0   :  { %7 = vsyncpa [#allocation5], 0  ;;  %s262_s0 = inlined_call_operand.hbm [shape: f32[16,128], index: 0, kind: input, shape index: {}]   ;;  %s263_s1 = inlined_call_operand.hbm [shape: f32[16,128], index: 1, kind: input, shape index: {}]   ;;  %s264_s2 = inlined_call_operand.hbm [shape: f32[2], index: 2, kind: output, shape index: {}]  }
   0x1   :  { %8 = vsyncpa [#allocation8], 0 }
   0x2   :  { %9 = vsyncpa [#allocation6], 0  ;;  %s205_s9 = smov [#allocation4]   ;;  %s145_s13 = scalar_lea.hbm %s262_s0, 256 }
   0x3   :  { %s15_s10 = sshll.u32 %s205_s9, 4  ;;  %p146_p0 = scmp.ne.s32.totalorder %s262_s0, %s145_s13  ;;  %s16_s10 = int_to_ptr.vmem [resolvable:$true] %s15_s10 }
   0x4   :  { %p149_p1 = scmp.lt.u32.totalorder %s145_s13, %s262_s0 }
   0x6   :  { %p151_p2 = pnand %p149_p1, %p146_p0 }
   0x8   :  { %154 = shalt.err (!%p151_p2)
}
   0x9   :  { %s155_s18 = scalar_lea.vmem %s16_s10, 256  ;;  %p160_p4 = scmp.lt.s32.totalorder %s16_s10, %s16_s10 }
   0xa   :  { %p156_p3 = scmp.ne.s32.totalorder %s16_s10, %s155_s18  ;;  %p161_p5 = scmp.lt.s32.totalorder %s155_s18, %s155_s18 }
   0xc   :  { %p162_p6 = por %p161_p5, %p160_p4 }
   0xe   :  { %p163_p7 = pnand %p162_p6, %p156_p3 }
  0x10   :  { %166 = shalt.err (!%p163_p7)
}
  0x11   :  { %s206_s19 = smov 128   ;;  %s207_s20 = smov 8  }
  0x12   :  { %21 = dma.hbm_to_vmem [thread:$0]  %s262_s0, 256, %s16_s10, [#allocation5], %s206_s19, %s206_s19, %s207_s20  }
  0x13   :  { %s208_s23 = smov [#allocation7]   ;;  %s167_s27 = scalar_lea.hbm %s263_s1, 256 }
  0x14   :  { %s27_s24 = sshll.u32 %s208_s23, 4  ;;  %p168_p8 = scmp.ne.s32.totalorder %s263_s1, %s167_s27  ;;  %s28_s24 = int_to_ptr.vmem [resolvable:$true] %s27_s24 }
  0x15   :  { %p171_p9 = scmp.lt.u32.totalorder %s167_s27, %s263_s1 }
  0x17   :  { %p173_p10 = pnand %p171_p9, %p168_p8 }
  0x19   :  { %176 = shalt.err (!%p173_p10)
}
  0x1a   :  { %s177_s4 = scalar_lea.vmem %s28_s24, 256  ;;  %p182_p12 = scmp.lt.s32.totalorder %s28_s24, %s28_s24 }
  0x1b   :  { %p178_p11 = scmp.ne.s32.totalorder %s28_s24, %s177_s4  ;;  %p183_p13 = scmp.lt.s32.totalorder %s177_s4, %s177_s4 }
  0x1d   :  { %p184_p0 = por %p183_p13, %p182_p12 }
  0x1f   :  { %p185_p1 = pnand %p184_p0, %p178_p11 }
  0x21   :  { %188 = shalt.err (!%p185_p1)
}
  0x22   :  { %33 = dma.hbm_to_vmem [thread:$0]  %s263_s1, 256, %s28_s24, [#allocation8], %s206_s19, %s206_s19, %s207_s20  }
  0x23   :  { %199 = dma.done.wait [#allocation5], 256  }
  0x24   :  { %200 = vsyncadd [#allocation5], 4294967040 }
  0x25   :  { %201 = dma.done.wait [#allocation8], 256  }
  0x26   :  { %202 = vsyncadd [#allocation8], 4294967040  ;;  %v209_v0 = vmov 0.0   ;;  %v46_v1 = vld [vmem:[#allocation4] sm:$0xff]  ;;  %v47_v2 = vld [vmem:[#allocation4 + $0x8] sm:$0xff]  ;;  %vm90_vm4 = vcmask 1040384  }
  0x27   :  { %44 = vst [vmem:[#allocation2] sm:$0x1] %v209_v0  ;;  %45 = vst [vmem:[#allocation3] sm:$0x1] %v209_v0  ;;  %v54_v3 = vld [vmem:[#allocation7] sm:$0xff]  ;;  %vm48_vm0 = vcmp.gt.f32.partialorder %v46_v1, 0.5 }
  0x28   :  { %vm49_vm1 = vcmp.gt.f32.partialorder %v47_v2, 0.5  ;;  %v55_v4 = vld [vmem:[#allocation7 + $0x8] sm:$0xff]  ;;  %vm56_vm2 = vcmp.gt.f32.partialorder %v54_v3, 0.5  ;;  %v131_v5 = vsel %vm48_vm0, 1.0, %v209_v0  ;;  %s189_s9 = scalar_lea.hbm %s264_s2, 16 }
  0x29   :  { %v132_v6 = vsel %vm49_vm1, 1.0, %v209_v0  ;;  %vm57_vm3 = vcmp.gt.f32.partialorder %v55_v4, 0.5  ;;  %v133_v7 = vsel %vm56_vm2, 1.0, %v209_v0  ;;  %p190_p2 = scmp.ne.s32.totalorder %s264_s2, %s189_s9  ;;  %p193_p3 = scmp.lt.u32.totalorder %s189_s9, %s264_s2 }
  0x2a   :  { %v134_v8 = vsel %vm57_vm3, 1.0, %v209_v0  ;;  %v63_v9 = vmul.f32 %v133_v7, %v131_v5  ;;  %v75_v10 = vadd.f32 %v133_v7, %v131_v5 }
  0x2b   :  { %v64_v11 = vmul.f32 %v134_v8, %v132_v6  ;;  %v76_v12 = vadd.f32 %v134_v8, %v132_v6  ;;  %p195_p4 = pnand %p193_p3, %p190_p2 }
  0x2d   :  { %v65_v13 = vadd.f32 %v64_v11, %v63_v9  ;;  %v77_v14 = vadd.f32 %v76_v12, %v75_v10 }
  0x2e   :  { %v62_v25 = vld [vmem:[#allocation2] sm:$0x1]  ;;  %v74_v26 = vld [vmem:[#allocation3] sm:$0x1] }
  0x2f   :  { %v66_v15 = vrot.slane %v65_v13, 4  ;;  %v78_v16 = vrot.slane %v77_v14, 4 }
  0x31   :  { %v67_v17 = vadd.f32 %v66_v15, %v65_v13  ;;  %v79_v18 = vadd.f32 %v78_v16, %v77_v14 }
  0x33   :  { %v68_v19 = vrot.slane %v67_v17, 2  ;;  %v80_v20 = vrot.slane %v79_v18, 2 }
  0x35   :  { %v69_v21 = vadd.f32 %v68_v19, %v67_v17  ;;  %v81_v22 = vadd.f32 %v80_v20, %v79_v18 }
  0x37   :  { %v70_v23 = vrot.slane %v69_v21, 1  ;;  %v82_v24 = vrot.slane %v81_v22, 1 }
  0x39   :  { %v71_v27 = vadd.f32 %v70_v23, %v69_v21  ;;  %v83_v28 = vadd.f32 %v82_v24, %v81_v22 }
  0x3b   :  { %v72_v29 = vadd.f32 %v71_v27, %v62_v25  ;;  %v84_v30 = vadd.f32 %v83_v28, %v74_v26 }
  0x3d   :  { %73 = vst [vmem:[#allocation2] sm:$0x1] %v72_v29  ;;  %85 = vst [vmem:[#allocation3] sm:$0x1] %v84_v30 }
  0x44   :  { %v89_v31 = vld [vmem:[#allocation2] sm:$0x1]  ;;  %v103_v32 = vld [vmem:[#allocation3] sm:$0x1] }
  0x45   :  { %v91_v33 = vsel %vm90_vm4, %v89_v31, 0.0  ;;  %v104_v34 = vsel %vm90_vm4, %v103_v32, 0.0 }
  0x46   :  { %92 = vadd.xlane.f32.xlu0 %v91_v33 }
  0x4a   :  { %105 = vadd.xlane.f32.xlu0 %v104_v34 }
  0xd3   :  { %v93_v35 = vpop.xlane.xlu0 %92 }
  0xd4   :  { %v94_v36 = vrot.slane %v93_v35, 4 }
  0xd6   :  { %v95_v37 = vadd.f32 %v94_v36, %v93_v35 }
  0xd7   :  { %v106_v38 = vpop.xlane.xlu0 %105 }
  0xd8   :  { %v96_v39 = vrot.slane %v95_v37, 2  ;;  %v107_v40 = vrot.slane %v106_v38, 4 }
  0xda   :  { %v108_v41 = vadd.f32 %v107_v40, %v106_v38  ;;  %v97_v42 = vadd.f32 %v96_v39, %v95_v37 }
  0xdc   :  { %v109_v43 = vrot.slane %v108_v41, 2  ;;  %v98_v44 = vrot.slane %v97_v42, 1 }
  0xde   :  { %v110_v45 = vadd.f32 %v109_v43, %v108_v41  ;;  %v99_v46 = vadd.f32 %v98_v44, %v97_v42 }
  0xe0   :  { %135 = vpush %v99_v46  ;;  %v111_v47 = vrot.slane %v110_v45, 1 }
  0xe2   :  { %v112_v48 = vadd.f32 %v111_v47, %v110_v45 }
  0xe4   :  { %137 = vpush %v112_v48 }
 0x111   :  { %s136_s1 = spop %135 }
 0x112   :  { %102 = sst [smem:[#allocation9]] %s136_s1 }
 0x115   :  { %s138_s6 = spop %137 }
 0x116   :  { %115 = sst [smem:[#allocation9 + $0x1]] %s138_s6 }
 0x117   :  { %198 = shalt.err (!%p195_p4)
}
 0x118   :  { %s210_s14 = smov [#allocation9]  }
 0x119   :  { %123 = dma.smem_to_hbm %s210_s14, 16, %s264_s2, [#allocation6]  }
 0x11a   :  { %203 = dma.done.wait [#allocation6], 16  }
 0x11b   :  { %204 = vsyncadd [#allocation6], 4294967280 }
 0x11c   :  { %127 = sfence }
 0x11d   :  { %128 = vsyncpa [#allocation5], 1 }
 0x11e   :  { %129 = vsyncpa [#allocation8], 1 }
 0x11f   :  { %130 = vsyncpa [#allocation6], 1 }

</bundles_post_ra>
